<compile_context>
chip_gen: v5e
topology: v5e:2x2
jax: 0.10.0
libtpu: 0.0.40
codegen_flags: <defaults>
</compile_context>

<pallas_src>
import functools

import jax
import jax.numpy as jnp
from jax.experimental import pallas as pl
from jax.experimental.pallas import tpu as pltpu


_LANE = 128
_VMEM_LIMIT_BYTES = 48 * 1024 * 1024   # safe on v5e/v6e (128 MiB) and v7x (64 MiB)


def _round_up(x, m):
    return (x + m - 1) // m * m


def _choose_tiles(n):
    """Returns (n_padded, tm, tk)."""
    if n <= 512:
        # Single whole-array block, lane-dense (multiple of 128).
        n_p = _round_up(max(n, 1), _LANE)
        return n_p, n_p, n_p
    # Large-graph path: big tiles so DMA time dominates the ~0.35us/step
    # overhead.  A tile = 1024x2048 bf16 = 4 MiB; ~11 MiB double-buffered
    # total -> fits v7x's 64 MiB VMEM with headroom, and n_p >= 2048 keeps
    # >= 2 "parallel" row blocks for megacore.
    tm, tk = 1024, 2048
    n_p = _round_up(n, tk)              # divisible by both tm and tk
    return n_p, tm, tk


# ----------------------------------------------------------------------------
# Layer-1 kernel:  T2 = relu( A @ (X W1) + b1 ) @ W2      (bf16 output)
# grid = (i over output row blocks [parallel], k over A column blocks [arbitrary])
# ----------------------------------------------------------------------------
def _gcn_layer1_kernel(a_ref, x_ref, w1_ref, b1_ref, w2_ref, o_ref, acc_ref):
    k = pl.program_id(1)

    @pl.when(k == 0)
    def _():
        acc_ref[...] = jnp.zeros_like(acc_ref)

    # K=1 feature transform: rank-1 broadcast multiply on the VPU (no MXU op).
    t = x_ref[...].astype(jnp.float32) * w1_ref[...].astype(jnp.float32)

    # Normalized-adjacency aggregation on the MXU: bf16 inputs, f32 accumulate.
    acc_ref[...] += jnp.dot(a_ref[...], t.astype(a_ref.dtype),
                            preferred_element_type=jnp.float32)

    # Fused epilogue on the last reduction step (stays in VMEM):
    # bias + ReLU + the layer-2 feature transform H @ W2 (hoisted out of
    # layer 2's reduction loop -> done exactly once per output row block).
    @pl.when(k == pl.num_programs(1) - 1)
    def _():
        h = jnp.maximum(acc_ref[...] + b1_ref[...], 0.0)          # (tm, H_pad)
        o_ref[...] = jnp.dot(h.astype(w2_ref.dtype), w2_ref[...],
                             preferred_element_type=jnp.float32
                             ).astype(o_ref.dtype)                # (tm, C_pad)


def _layer1_call(a_p, x_p, w1_p, b1_p, w2_p, *, tm, tk):
    n_p = a_p.shape[0]
    in_ch = x_p.shape[1]
    hidden_p = w1_p.shape[1]
    out_p = w2_p.shape[1]
    grid = (n_p // tm, n_p // tk)
    return pl.pallas_call(
        _gcn_layer1_kernel,
        out_shape=jax.ShapeDtypeStruct((n_p, out_p), jnp.bfloat16),
        grid_spec=pltpu.PrefetchScalarGridSpec(
            num_scalar_prefetch=0,
            grid=grid,
            in_specs=[
                pl.BlockSpec((tm, tk), lambda i, k: (i, k)),              # A tile
                pl.BlockSpec((tk, in_ch), lambda i, k: (k, 0)),           # X tile
                pl.BlockSpec((1, hidden_p), lambda i, k: (0, 0)),         # W1 (resident)
                pl.BlockSpec((1, hidden_p), lambda i, k: (0, 0)),         # b1 (resident)
                pl.BlockSpec((hidden_p, out_p), lambda i, k: (0, 0)),     # W2 (resident)
            ],
            out_specs=pl.BlockSpec((tm, out_p), lambda i, k: (i, 0)),
            scratch_shapes=[pltpu.VMEM((tm, hidden_p), jnp.float32)],
        ),
        compiler_params=pltpu.CompilerParams(
            dimension_semantics=("parallel", "arbitrary"),
            vmem_limit_bytes=_VMEM_LIMIT_BYTES),
    )(a_p, x_p, w1_p, b1_p, w2_p)


# ----------------------------------------------------------------------------
# Layer-2 kernel:  out = log_softmax( A @ T2 + b2 )        (pure aggregation)
# ----------------------------------------------------------------------------
def _gcn_layer2_kernel(a_ref, t_ref, b2_ref, o_ref, acc_ref):
    k = pl.program_id(1)

    @pl.when(k == 0)
    def _():
        acc_ref[...] = jnp.zeros_like(acc_ref)

    # Kernel body is a single bf16 MXU matmul per step, f32 accumulate.
    acc_ref[...] += jnp.dot(a_ref[...], t_ref[...],
                            preferred_element_type=jnp.float32)

    @pl.when(k == pl.num_programs(1) - 1)
    def _():
        # Padded class lanes carry a -1e30 bias -> vanish in log_softmax
        # (safe because z / the accumulator stay f32).
        z = acc_ref[...] + b2_ref[...]
        m = jnp.max(z, axis=1, keepdims=True)
        zs = z - m
        lse = jnp.log(jnp.sum(jnp.exp(zs), axis=1, keepdims=True))
        o_ref[...] = (zs - lse).astype(o_ref.dtype)


def _layer2_call(a_p, t2, b2_p, *, tm, tk):
    n_p = a_p.shape[0]
    out_p = b2_p.shape[1]
    grid = (n_p // tm, n_p // tk)
    return pl.pallas_call(
        _gcn_layer2_kernel,
        out_shape=jax.ShapeDtypeStruct((n_p, out_p), jnp.float32),
        grid_spec=pltpu.PrefetchScalarGridSpec(
            num_scalar_prefetch=0,
            grid=grid,
            in_specs=[
                pl.BlockSpec((tm, tk), lambda i, k: (i, k)),          # A tile
                pl.BlockSpec((tk, out_p), lambda i, k: (k, 0)),       # T2 tile
                pl.BlockSpec((1, out_p), lambda i, k: (0, 0)),        # b2 (resident)
            ],
            out_specs=pl.BlockSpec((tm, out_p), lambda i, k: (i, 0)),
            scratch_shapes=[pltpu.VMEM((tm, out_p), jnp.float32)],
        ),
        compiler_params=pltpu.CompilerParams(
            dimension_semantics=("parallel", "arbitrary"),
            vmem_limit_bytes=_VMEM_LIMIT_BYTES),
    )(a_p, t2, b2_p)


# ----------------------------------------------------------------------------
# Padding / casting (one-time, outside the hot path: A is static per graph)
# ----------------------------------------------------------------------------
def prepare_gcn_inputs(a_norm, x, w1, b1, w2, b2):
    n, in_ch = x.shape
    hidden = w1.shape[1]
    c_out = w2.shape[1]
    n_p, tm, tk = _choose_tiles(n)
    hidden_p = _round_up(hidden, _LANE)          # 16 -> 128 (lane-dense)
    out_p = _round_up(c_out, _LANE)              # 2  -> 128

    # Cast A to bf16 BEFORE padding: avoids a full n_p^2 f32 intermediate.
    a_p = (jnp.zeros((n_p, n_p), jnp.bfloat16)
           .at[:n, :n].set(a_norm.astype(jnp.bfloat16)))
    x_p = jnp.zeros((n_p, in_ch), jnp.float32).at[:n, :].set(x)
    w1_p = jnp.zeros((in_ch, hidden_p), jnp.float32).at[:, :hidden].set(w1)
    b1_p = jnp.zeros((1, hidden_p), jnp.float32).at[:, :hidden].set(b1)
    w2_p = (jnp.zeros((hidden_p, out_p), jnp.float32)
            .at[:hidden, :c_out].set(w2).astype(jnp.bfloat16))
    # Padded logit lanes get a huge negative bias so they vanish in log_softmax.
    b2_p = jnp.full((1, out_p), -1e30, jnp.float32).at[:, :c_out].set(b2)

    padded = (a_p, x_p, w1_p, b1_p, w2_p, b2_p)
    meta = dict(n=n, c_out=c_out, tm=tm, tk=tk)
    return padded, meta


@functools.partial(jax.jit, static_argnames=("tm", "tk"))
def gcn_forward_padded(a_p, x_p, w1_p, b1_p, w2_p, b2_p, *, tm, tk):
    # Layer 1 fused with layer 2's feature transform: T2 = relu(A X W1 + b1) W2
    t2 = _layer1_call(a_p, x_p, w1_p, b1_p, w2_p, tm=tm, tk=tk)
    # TODO(synk): F.dropout(training=self.training) skipped — inference-mode
    # identity; stochastic dropout would use pltpu.prng_random_bits.
    # Layer 2: log_softmax(A @ T2 + b2, axis=1)
    return _layer2_call(a_p, t2, b2_p, tm=tm, tk=tk)


def gcn_forward(a_norm, x, w1, b1, w2, b2):
    padded, meta = prepare_gcn_inputs(a_norm, x, w1, b1, w2, b2)
    z = gcn_forward_padded(*padded, tm=meta["tm"], tk=meta["tk"])
    return z[:meta["n"], :meta["c_out"]]


# ----------------------------------------------------------------------------
# Glue: dense D^-1/2 (A + I) D^-1/2 from edge_index (PyG gcn_norm semantics,
# add_remaining_self_loops: only nodes without an existing self-loop get one).
# ----------------------------------------------------------------------------
def normalized_adjacency(edge_index, num_nodes):
    src = edge_index[0]
    dst = edge_index[1]
    a = jnp.zeros((num_nodes, num_nodes), jnp.float32).at[dst, src].add(1.0)
    diag = jnp.diagonal(a)
    a = a + jnp.diag(jnp.where(diag > 0, 0.0, 1.0))     # remaining self-loops
    deg = jnp.sum(a, axis=1)
    dinv = jnp.where(deg > 0, 1.0 / jnp.sqrt(deg), 0.0)
    return a * dinv[:, None] * dinv[None, :]


def glorot(key, shape):
    fan_in, fan_out = shape
    limit = jnp.sqrt(6.0 / (fan_in + fan_out))
    return jax.random.uniform(key, shape, jnp.float32, -limit, limit)


def reference_forward(a_norm, x, w1, b1, w2, b2):
    h = a_norm @ (x @ w1) + b1
    h = jnp.maximum(h, 0.0)
    z = a_norm @ (h @ w2) + b2
    return jax.nn.log_softmax(z, axis=1)


if __name__ == "__main__":
    # Exact example data from the module's source.
    edge_index = jnp.array([[3, 1, 1, 2], [1, 3, 2, 1]], dtype=jnp.int32)
    x = jnp.array([[-1.0], [0.0], [1.0], [-1.0]], dtype=jnp.float32)

    num_nodes = x.shape[0]        # 4
    in_ch, hidden, out_ch = 1, 16, 2

    # Deterministic parameter init (GCNConv(1,16) and GCNConv(16,2)).
    key = jax.random.PRNGKey(0)
    k1, k2 = jax.random.split(key)
    w1 = glorot(k1, (in_ch, hidden))                  # (1, 16)
    b1 = jnp.zeros((1, hidden), jnp.float32)
    w2 = glorot(k2, (hidden, out_ch))                 # (16, 2)
    b2 = jnp.zeros((1, out_ch), jnp.float32)

    a_norm = normalized_adjacency(edge_index, num_nodes)

    out = gcn_forward(a_norm, x, w1, b1, w2, b2)
    out = jax.block_until_ready(out)

    ref = reference_forward(a_norm, x, w1, b1, w2, b2)
    assert out.shape == (num_nodes, out_ch)
    assert bool(jnp.all(jnp.isfinite(out)))
    # bf16 aggregation operands -> loosened (but still tight) tolerance vs f32 ref.
    assert jnp.allclose(out, ref, atol=3e-2, rtol=3e-2), (out, ref)

    print("KERNEL_OK")
</pallas_src>

<mosaic_0001>
module attributes {stable_mosaic.version = 11 : i64} {
  func.func @_gcn_layer2_kernel(%arg0: i32, %arg1: i32, %arg2: memref<128x128xbf16, #tpu.memory_space<vmem>>, %arg3: memref<128x128xbf16, #tpu.memory_space<vmem>>, %arg4: memref<1x128xf32, #tpu.memory_space<vmem>>, %arg5: memref<128x128xf32, #tpu.memory_space<vmem>>, %arg6: memref<128x128xf32, #tpu.memory_space<vmem>>) attributes {dimension_semantics = [#tpu.dimension_semantics<parallel>, #tpu.dimension_semantics<arbitrary>], iteration_bounds = array<i64: 1, 1>, scalar_prefetch = 0 : i64, scratch_operands = 1 : i64, tpu.core_type = #tpu.core_type<tc>, window_params = [{transform_indices = @transform_0, window_bounds = array<i64: 128, 128>}, {transform_indices = @transform_1, window_bounds = array<i64: 128, 128>}, {pipeline_mode = #tpu.pipeline_mode<synchronous>, transform_indices = @transform_2, window_bounds = array<i64: 1, 128>}, {transform_indices = @transform_3, window_bounds = array<i64: 128, 128>}]} {
    %c0_i32 = arith.constant 0 : i32
    %0 = arith.cmpi eq, %arg1, %c0_i32 : i32
    %1 = arith.extui %0 : i1 to i32
    %c0_i32_0 = arith.constant 0 : i32
    %2 = arith.cmpi ne, %1, %c0_i32_0 : i32
    scf.if %2 {
      %cst_10 = arith.constant 0.000000e+00 : f32
      %12 = vector.broadcast %cst_10 : f32 to vector<128x128xf32>
      %c0_11 = arith.constant 0 : index
      %c0_12 = arith.constant 0 : index
      %13 = vector.load %arg6[%c0_11, %c0_12] : memref<128x128xf32, #tpu.memory_space<vmem>>, vector<128x128xf32>
      tpu.vector_store %arg6[%c0_11, %c0_12], %12 {strides = array<i32>} : memref<128x128xf32, #tpu.memory_space<vmem>>, vector<128x128xf32>,
    } else {
    }
    %c0 = arith.constant 0 : index
    %c0_1 = arith.constant 0 : index
    %3 = vector.load %arg6[%c0, %c0_1] : memref<128x128xf32, #tpu.memory_space<vmem>>, vector<128x128xf32>
    %c0_2 = arith.constant 0 : index
    %c0_3 = arith.constant 0 : index
    %4 = vector.load %arg2[%c0_2, %c0_3] : memref<128x128xbf16, #tpu.memory_space<vmem>>, vector<128x128xbf16>
    %c0_4 = arith.constant 0 : index
    %c0_5 = arith.constant 0 : index
    %5 = vector.load %arg3[%c0_4, %c0_5] : memref<128x128xbf16, #tpu.memory_space<vmem>>, vector<128x128xbf16>
    %cst = arith.constant dense<0.000000e+00> : vector<128x128xf32>
    %6 = tpu.matmul %4, %5, %cst {dimension_numbers = #tpu.dot_dimension_numbers<[1], [0], [0], [1], [0, 0, 1, 1], [], []>} : vector<128x128xbf16>, vector<128x128xbf16>, vector<128x128xf32> -> vector<128x128xf32>
    %7 = arith.addf %3, %6 : vector<128x128xf32>
    %c0_6 = arith.constant 0 : index
    %c0_7 = arith.constant 0 : index
    %8 = vector.load %arg6[%c0_6, %c0_7] : memref<128x128xf32, #tpu.memory_space<vmem>>, vector<128x128xf32>
    tpu.vector_store %arg6[%c0_6, %c0_7], %7 {strides = array<i32>} : memref<128x128xf32, #tpu.memory_space<vmem>>, vector<128x128xf32>,
    %c0_i32_8 = arith.constant 0 : i32
    %9 = arith.cmpi eq, %arg1, %c0_i32_8 : i32
    %10 = arith.extui %9 : i1 to i32
    %c0_i32_9 = arith.constant 0 : i32
    %11 = arith.cmpi ne, %10, %c0_i32_9 : i32
    scf.if %11 {
      %c0_10 = arith.constant 0 : index
      %c0_11 = arith.constant 0 : index
      %12 = vector.load %arg6[%c0_10, %c0_11] : memref<128x128xf32, #tpu.memory_space<vmem>>, vector<128x128xf32>
      %c0_12 = arith.constant 0 : index
      %c0_13 = arith.constant 0 : index
      %13 = vector.load %arg4[%c0_12, %c0_13] : memref<1x128xf32, #tpu.memory_space<vmem>>, vector<1x128xf32>
      %14 = vector.broadcast %13 : vector<1x128xf32> to vector<128x128xf32>
      %15 = arith.addf %12, %14 : vector<128x128xf32>
      %cst_14 = arith.constant dense<0xFF800000> : vector<128xf32>
      %16 = vector.multi_reduction <maximumf>, %15, %cst_14 [1] : vector<128x128xf32> to vector<128xf32>
      %17 = vector.shape_cast %16 : vector<128xf32> to vector<128x1xf32>
      %18 = vector.broadcast %17 : vector<128x1xf32> to vector<128x128xf32>
      %19 = arith.subf %15, %18 : vector<128x128xf32>
      %20 = math.exp %19 : vector<128x128xf32>
      %cst_15 = arith.constant dense<0.000000e+00> : vector<128xf32>
      %21 = vector.multi_reduction <add>, %20, %cst_15 [1] : vector<128x128xf32> to vector<128xf32>
      %22 = vector.shape_cast %21 : vector<128xf32> to vector<128x1xf32>
      %23 = math.log %22 : vector<128x1xf32>
      %24 = vector.broadcast %23 : vector<128x1xf32> to vector<128x128xf32>
      %25 = arith.subf %19, %24 : vector<128x128xf32>
      %c0_16 = arith.constant 0 : index
      %c0_17 = arith.constant 0 : index
      %26 = vector.load %arg5[%c0_16, %c0_17] : memref<128x128xf32, #tpu.memory_space<vmem>>, vector<128x128xf32>
      tpu.vector_store %arg5[%c0_16, %c0_17], %25 {strides = array<i32>} : memref<128x128xf32, #tpu.memory_space<vmem>>, vector<128x128xf32>,
    } else {
    }
    return
  }
  func.func @transform_0(%arg0: i32, %arg1: i32) -> (i32, i32) {
    %c0_i32 = arith.constant 0 : i32
    return %arg0, %arg1 : i32, i32
  }
  func.func @transform_1(%arg0: i32, %arg1: i32) -> (i32, i32) {
    %c0_i32 = arith.constant 0 : i32
    %c0_i32_0 = arith.constant 0 : i32
    return %arg1, %c0_i32 : i32, i32
  }
  func.func @transform_2(%arg0: i32, %arg1: i32) -> (i32, i32) {
    %c0_i32 = arith.constant 0 : i32
    %c0_i32_0 = arith.constant 0 : i32
    %c0_i32_1 = arith.constant 0 : i32
    return %c0_i32, %c0_i32_0 : i32, i32
  }
  func.func @transform_3(%arg0: i32, %arg1: i32) -> (i32, i32) {
    %c0_i32 = arith.constant 0 : i32
    %c0_i32_0 = arith.constant 0 : i32
    return %arg0, %c0_i32 : i32, i32
  }
}

module attributes {stable_mosaic.version = 11 : i64} {
  func.func @_gcn_layer1_kernel(%arg0: i32, %arg1: i32, %arg2: memref<128x128xbf16, #tpu.memory_space<vmem>>, %arg3: memref<128x1xf32, #tpu.memory_space<vmem>>, %arg4: memref<1x128xf32, #tpu.memory_space<vmem>>, %arg5: memref<1x128xf32, #tpu.memory_space<vmem>>, %arg6: memref<128x128xbf16, #tpu.memory_space<vmem>>, %arg7: memref<128x128xbf16, #tpu.memory_space<vmem>>, %arg8: memref<128x128xf32, #tpu.memory_space<vmem>>) attributes {dimension_semantics = [#tpu.dimension_semantics<parallel>, #tpu.dimension_semantics<arbitrary>], iteration_bounds = array<i64: 1, 1>, scalar_prefetch = 0 : i64, scratch_operands = 1 : i64, tpu.core_type = #tpu.core_type<tc>, window_params = [{transform_indices = @transform_0, window_bounds = array<i64: 128, 128>}, {transform_indices = @transform_1, window_bounds = array<i64: 128, 1>}, {pipeline_mode = #tpu.pipeline_mode<synchronous>, transform_indices = @transform_2, window_bounds = array<i64: 1, 128>}, {pipeline_mode = #tpu.pipeline_mode<synchronous>, transform_indices = @transform_3, window_bounds = array<i64: 1, 128>}, {pipeline_mode = #tpu.pipeline_mode<synchronous>, transform_indices = @transform_4, window_bounds = array<i64: 128, 128>}, {transform_indices = @transform_5, window_bounds = array<i64: 128, 128>}]} {
    %c0_i32 = arith.constant 0 : i32
    %0 = arith.cmpi eq, %arg1, %c0_i32 : i32
    %1 = arith.extui %0 : i1 to i32
    %c0_i32_0 = arith.constant 0 : i32
    %2 = arith.cmpi ne, %1, %c0_i32_0 : i32
    scf.if %2 {
      %cst_12 = arith.constant 0.000000e+00 : f32
      %17 = vector.broadcast %cst_12 : f32 to vector<128x128xf32>
      %c0_13 = arith.constant 0 : index
      %c0_14 = arith.constant 0 : index
      %18 = vector.load %arg8[%c0_13, %c0_14] : memref<128x128xf32, #tpu.memory_space<vmem>>, vector<128x128xf32>
      tpu.vector_store %arg8[%c0_13, %c0_14], %17 {strides = array<i32>} : memref<128x128xf32, #tpu.memory_space<vmem>>, vector<128x128xf32>,
    } else {
    }
    %c0 = arith.constant 0 : index
    %c0_1 = arith.constant 0 : index
    %3 = vector.load %arg3[%c0, %c0_1] : memref<128x1xf32, #tpu.memory_space<vmem>>, vector<128x1xf32>
    %c0_2 = arith.constant 0 : index
    %c0_3 = arith.constant 0 : index
    %4 = vector.load %arg4[%c0_2, %c0_3] : memref<1x128xf32, #tpu.memory_space<vmem>>, vector<1x128xf32>
    %5 = vector.broadcast %3 : vector<128x1xf32> to vector<128x128xf32>
    %6 = vector.broadcast %4 : vector<1x128xf32> to vector<128x128xf32>
    %7 = arith.mulf %5, %6 : vector<128x128xf32>
    %c0_4 = arith.constant 0 : index
    %c0_5 = arith.constant 0 : index
    %8 = vector.load %arg8[%c0_4, %c0_5] : memref<128x128xf32, #tpu.memory_space<vmem>>, vector<128x128xf32>
    %c0_6 = arith.constant 0 : index
    %c0_7 = arith.constant 0 : index
    %9 = vector.load %arg2[%c0_6, %c0_7] : memref<128x128xbf16, #tpu.memory_space<vmem>>, vector<128x128xbf16>
    %10 = arith.truncf %7 : vector<128x128xf32> to vector<128x128xbf16>
    %cst = arith.constant dense<0.000000e+00> : vector<128x128xf32>
    %11 = tpu.matmul %9, %10, %cst {dimension_numbers = #tpu.dot_dimension_numbers<[1], [0], [0], [1], [0, 0, 1, 1], [], []>} : vector<128x128xbf16>, vector<128x128xbf16>, vector<128x128xf32> -> vector<128x128xf32>
    %12 = arith.addf %8, %11 : vector<128x128xf32>
    %c0_8 = arith.constant 0 : index
    %c0_9 = arith.constant 0 : index
    %13 = vector.load %arg8[%c0_8, %c0_9] : memref<128x128xf32, #tpu.memory_space<vmem>>, vector<128x128xf32>
    tpu.vector_store %arg8[%c0_8, %c0_9], %12 {strides = array<i32>} : memref<128x128xf32, #tpu.memory_space<vmem>>, vector<128x128xf32>,
    %c0_i32_10 = arith.constant 0 : i32
    %14 = arith.cmpi eq, %arg1, %c0_i32_10 : i32
    %15 = arith.extui %14 : i1 to i32
    %c0_i32_11 = arith.constant 0 : i32
    %16 = arith.cmpi ne, %15, %c0_i32_11 : i32
    scf.if %16 {
      %c0_12 = arith.constant 0 : index
      %c0_13 = arith.constant 0 : index
      %17 = vector.load %arg8[%c0_12, %c0_13] : memref<128x128xf32, #tpu.memory_space<vmem>>, vector<128x128xf32>
      %c0_14 = arith.constant 0 : index
      %c0_15 = arith.constant 0 : index
      %18 = vector.load %arg5[%c0_14, %c0_15] : memref<1x128xf32, #tpu.memory_space<vmem>>, vector<1x128xf32>
      %19 = vector.broadcast %18 : vector<1x128xf32> to vector<128x128xf32>
      %20 = arith.addf %17, %19 : vector<128x128xf32>
      %cst_16 = arith.constant 0.000000e+00 : f32
      %21 = vector.broadcast %cst_16 : f32 to vector<128x128xf32>
      %22 = arith.maximumf %20, %21 : vector<128x128xf32>
      %23 = arith.truncf %22 : vector<128x128xf32> to vector<128x128xbf16>
      %c0_17 = arith.constant 0 : index
      %c0_18 = arith.constant 0 : index
      %24 = vector.load %arg6[%c0_17, %c0_18] : memref<128x128xbf16, #tpu.memory_space<vmem>>, vector<128x128xbf16>
      %cst_19 = arith.constant dense<0.000000e+00> : vector<128x128xf32>
      %25 = tpu.matmul %23, %24, %cst_19 {dimension_numbers = #tpu.dot_dimension_numbers<[1], [0], [0], [1], [0, 0, 1, 1], [], []>} : vector<128x128xbf16>, vector<128x128xbf16>, vector<128x128xf32> -> vector<128x128xf32>
      %26 = arith.truncf %25 : vector<128x128xf32> to vector<128x128xbf16>
      %c0_20 = arith.constant 0 : index
      %c0_21 = arith.constant 0 : index
      %27 = vector.load %arg7[%c0_20, %c0_21] : memref<128x128xbf16, #tpu.memory_space<vmem>>, vector<128x128xbf16>
      tpu.vector_store %arg7[%c0_20, %c0_21], %26 {strides = array<i32>} : memref<128x128xbf16, #tpu.memory_space<vmem>>, vector<128x128xbf16>,
    } else {
    }
    return
  }
  func.func @transform_0(%arg0: i32, %arg1: i32) -> (i32, i32) {
    %c0_i32 = arith.constant 0 : i32
    return %arg0, %arg1 : i32, i32
  }
  func.func @transform_1(%arg0: i32, %arg1: i32) -> (i32, i32) {
    %c0_i32 = arith.constant 0 : i32
    %c0_i32_0 = arith.constant 0 : i32
    return %arg1, %c0_i32 : i32, i32
  }
  func.func @transform_2(%arg0: i32, %arg1: i32) -> (i32, i32) {
    %c0_i32 = arith.constant 0 : i32
    %c0_i32_0 = arith.constant 0 : i32
    %c0_i32_1 = arith.constant 0 : i32
    return %c0_i32, %c0_i32_0 : i32, i32
  }
  func.func @transform_3(%arg0: i32, %arg1: i32) -> (i32, i32) {
    %c0_i32 = arith.constant 0 : i32
    %c0_i32_0 = arith.constant 0 : i32
    %c0_i32_1 = arith.constant 0 : i32
    return %c0_i32, %c0_i32_0 : i32, i32
  }
  func.func @transform_4(%arg0: i32, %arg1: i32) -> (i32, i32) {
    %c0_i32 = arith.constant 0 : i32
    %c0_i32_0 = arith.constant 0 : i32
    %c0_i32_1 = arith.constant 0 : i32
    return %c0_i32, %c0_i32_0 : i32, i32
  }
  func.func @transform_5(%arg0: i32, %arg1: i32) -> (i32, i32) {
    %c0_i32 = arith.constant 0 : i32
    %c0_i32_0 = arith.constant 0 : i32
    return %arg0, %c0_i32 : i32, i32
  }
}

</mosaic_0001>

<bundles_post_ra>
// kernel: gcn_forward_padded.3
= control target key start
LH: loop header
LB: loop body
LE: loop exit
PB: predicated region body
PF: predicated region fallthrough
CT: control target
= control target key end

     0   :  { %s860_s0 = inlined_call_operand.vmem [shape: bf16[128,128], index: 0, kind: input, shape index: {}]   ;;  %s861_s1 = inlined_call_operand.vmem [shape: bf16[128,128], index: 1, kind: input, shape index: {}]   ;;  %s862_s2 = inlined_call_operand.vmem [shape: f32[1,128], index: 2, kind: input, shape index: {}]   ;;  %s863_s3 = inlined_call_operand.hbm [shape: f32[128,128], index: 3, kind: output, shape index: {}]  }
   0x1   :  { %v572_v0 = vld [vmem:[%s861_s1 + $0x38] sm:$0xff]  ;;  %v571_v1 = vld [vmem:[%s861_s1 + $0x30] sm:$0xff] }
   0x2   :  { %179 = vmatpush.bf16.msra.mxu0 %v572_v0  ;;  %573 = vmatpush.bf16.msra.mxu1 %v572_v0 }
   0x3   :  { %574 = vmatpush.bf16.msra.mxu2 %v572_v0  ;;  %575 = vmatpush.bf16.msra.mxu3 %v572_v0 }
   0x4   :  { %8 = vsyncpa [#allocation4], 0  ;;  %v570_v2 = vld [vmem:[%s861_s1 + $0x28] sm:$0xff]  ;;  %v569_v3 = vld [vmem:[%s861_s1 + $0x20] sm:$0xff]  ;;  %s481_s20 = sshll.u32 %s863_s3, 4  ;;  %s692_s21 = smov 128   ;;  %s482_s20 = int_to_ptr.hbm [resolvable:$true] %s481_s20 }
   0x5   :  { %v568_v4 = vld [vmem:[%s861_s1 + $0x18] sm:$0xff]  ;;  %v567_v5 = vld [vmem:[%s861_s1 + $0x10] sm:$0xff]  ;;  %v566_v6 = vld [vmem:[%s861_s1 + $0x8] sm:$0xff]  ;;  %s693_s22 = smov 8  }
   0x6   :  { %180 = vmatpush.bf16.msra.mxu0 %v571_v1  ;;  %576 = vmatpush.bf16.msra.mxu1 %v571_v1  ;;  %v565_v7 = vld [vmem:[%s861_s1] sm:$0xff]  ;;  %v559_v9 = vld [vmem:[%s860_s0 + $0x10] sm:$0xff]  ;;  %v558_v12 = vld [vmem:[%s860_s0 + $0x8] sm:$0xff] }
   0x7   :  { %577 = vmatpush.bf16.msra.mxu2 %v571_v1  ;;  %578 = vmatpush.bf16.msra.mxu3 %v571_v1  ;;  %v557_v8 = vld [vmem:[%s860_s0] sm:$0xff]  ;;  %v563_v11 = vld [vmem:[%s860_s0 + $0x30] sm:$0xff]  ;;  %v560_v13 = vld [vmem:[%s860_s0 + $0x18] sm:$0xff] }
   0x8   :  { %v561_v10 = vld [vmem:[%s860_s0 + $0x20] sm:$0xff]  ;;  %v562_v14 = vld [vmem:[%s860_s0 + $0x28] sm:$0xff]  ;;  %v564_v15 = vld [vmem:[%s860_s0 + $0x38] sm:$0xff]  ;;  %s691_s0 = smov [#allocation3]  }
   0x9   :  { %v600_v16 = vld [vmem:[%s862_s2] ss:$0 sm:$0xff]  ;;  %s479_s2 = sshll.u32 %s691_s0, 4  ;;  %s480_s2 = int_to_ptr.vmem [resolvable:$true] %s479_s2 }
   0xa   :  { %181 = vmatpush.bf16.msra.mxu0 %v570_v2  ;;  %579 = vmatpush.bf16.msra.mxu1 %v570_v2 }
   0xb   :  { %580 = vmatpush.bf16.msra.mxu2 %v570_v2  ;;  %581 = vmatpush.bf16.msra.mxu3 %v570_v2 }
   0xe   :  { %182 = vmatpush.bf16.msra.mxu0 %v569_v3  ;;  %582 = vmatpush.bf16.msra.mxu1 %v569_v3 }
   0xf   :  { %583 = vmatpush.bf16.msra.mxu2 %v569_v3  ;;  %584 = vmatpush.bf16.msra.mxu3 %v569_v3 }
  0x12   :  { %183 = vmatpush.bf16.msra.mxu0 %v568_v4  ;;  %585 = vmatpush.bf16.msra.mxu1 %v568_v4 }
  0x13   :  { %586 = vmatpush.bf16.msra.mxu2 %v568_v4  ;;  %587 = vmatpush.bf16.msra.mxu3 %v568_v4 }
  0x16   :  { %184 = vmatpush.bf16.msra.mxu0 %v567_v5  ;;  %588 = vmatpush.bf16.msra.mxu1 %v567_v5 }
  0x17   :  { %589 = vmatpush.bf16.msra.mxu2 %v567_v5  ;;  %590 = vmatpush.bf16.msra.mxu3 %v567_v5 }
  0x1a   :  { %185 = vmatpush.bf16.msra.mxu0 %v566_v6  ;;  %591 = vmatpush.bf16.msra.mxu1 %v566_v6 }
  0x1b   :  { %592 = vmatpush.bf16.msra.mxu2 %v566_v6  ;;  %593 = vmatpush.bf16.msra.mxu3 %v566_v6 }
  0x1e   :  { %186 = vmatpush.bf16.msra.mxu0 %v565_v7  ;;  %594 = vmatpush.bf16.msra.mxu1 %v565_v7 }
  0x1f   :  { %595 = vmatpush.bf16.msra.mxu2 %v565_v7  ;;  %596 = vmatpush.bf16.msra.mxu3 %v565_v7 }
  0x21   :  { %187 = vmatmul.bf16.vlgmr.msra.gmra.mxu0 %v557_v8  ;;  %197 = vmatmul.bf16.vlgmr.msra.gmra.mxu1 %v559_v9 }
  0x22   :  { %207 = vmatmul.bf16.vlgmr.msra.gmra.mxu2 %v561_v10  ;;  %217 = vmatmul.bf16.vlgmr.msra.gmra.mxu3 %v563_v11 }
  0x31   :  { %192 = vmatmul.bf16.gmra.mxu0 %v558_v12  ;;  %202 = vmatmul.bf16.gmra.mxu1 %v560_v13 }
  0x32   :  { %212 = vmatmul.bf16.gmra.mxu2 %v562_v14  ;;  %222 = vmatmul.bf16.gmra.mxu3 %v564_v15 }
  0x9e   :  { %v188_v17 = vpop.f32.mrf.mxu0  ;;  %v198_v18 = vpop.f32.mrf.mxu1 }
  0x9f   :  { %v283_v19 = vadd.f32 %v600_v16, %v188_v17  ;;  %v287_v20 = vadd.f32 %v600_v16, %v198_v18 }
  0xa1   :  { %307 = vmax.xlane.f32.xlu2 %v287_v20  ;;  %299 = vmax.xlane.f32.xlu0 %v283_v19 }
  0xa5   :  { %v208_v21 = vpop.f32.mrf.mxu2  ;;  %v218_v22 = vpop.f32.mrf.mxu3 }
  0xa6   :  { %v291_v23 = vadd.f32 %v600_v16, %v208_v21  ;;  %v295_v24 = vadd.f32 %v600_v16, %v218_v22  ;;  %v190_v25 = vpop.f32.mrf.mxu0  ;;  %v200_v26 = vpop.f32.mrf.mxu1 }
  0xa7   :  { %v284_v29 = vadd.f32 %v600_v16, %v190_v25  ;;  %v288_v30 = vadd.f32 %v600_v16, %v200_v26 }
  0xa9   :  { %315 = vmax.xlane.f32.xlu2 %v291_v23  ;;  %323 = vmax.xlane.f32.xlu0 %v295_v24 }
  0xad   :  { %v210_v27 = vpop.f32.mrf.mxu2  ;;  %v220_v32 = vpop.f32.mrf.mxu3 }
  0xae   :  { %v193_v28 = vpop.f32.mrf.mxu0  ;;  %v292_v35 = vadd.f32 %v600_v16, %v210_v27  ;;  %v203_v37 = vpop.f32.mrf.mxu1  ;;  %v783_v48 = vadd.f32 %v600_v16, %v220_v32 }
  0xaf   :  { %v285_v31 = vadd.f32 %v600_v16, %v193_v28  ;;  %v765_v39 = vadd.f32 %v600_v16, %v203_v37 }
  0xb1   :  { %309 = vmax.xlane.f32.xlu2 %v288_v30  ;;  %301 = vmax.xlane.f32.xlu0 %v284_v29 }
  0xb2   :  { %303 = vmax.xlane.f32.xlu1 %v285_v31 }
  0xb5   :  { %v213_v33 = vpop.f32.mrf.mxu2  ;;  %v223_v36 = vpop.f32.mrf.mxu3 }
  0xb6   :  { %v293_v34 = vadd.f32 %v600_v16, %v213_v33  ;;  %v195_v38 = vpop.f32.mrf.mxu0  ;;  %v774_v44 = vadd.f32 %v600_v16, %v223_v36  ;;  %v205_v45 = vpop.f32.mrf.mxu1 }
  0xb7   :  { %v769_v42 = vadd.f32 %v600_v16, %v195_v38  ;;  %v778_v47 = vadd.f32 %v600_v16, %v205_v45 }
  0xb9   :  { %317 = vmax.xlane.f32.xlu0 %v292_v35 }
  0xba   :  { %319 = vmax.xlane.f32.xlu1 %v293_v34 }
  0xbd   :  { %v215_v40 = vpop.f32.mrf.mxu2  ;;  %v225_v43 = vpop.f32.mrf.mxu3 }
  0xbe   :  { %v767_v41 = vadd.f32 %v600_v16, %v215_v40  ;;  %v776_v46 = vadd.f32 %v600_v16, %v225_v43 }
  0xc0   :  { %321 = vmax.xlane.f32.xlu2 %v767_v41 }
  0xc1   :  { %311 = vmax.xlane.f32.xlu0 %v765_v39 }
  0xc2   :  { %305 = vmax.xlane.f32.xlu1 %v769_v42 }
  0xc8   :  { %327 = vmax.xlane.f32.xlu2 %v774_v44 }
  0xc9   :  { %329 = vmax.xlane.f32.xlu0 %v776_v46 }
  0xca   :  { %313 = vmax.xlane.f32.xlu1 %v778_v47 }
  0xd2   :  { %325 = vmax.xlane.f32.xlu1 %v783_v48 }
 0x114   :  { %v308_v49 = vpop.xlane.xlu2 %307  ;;  %v300_v50 = vpop.xlane.xlu0 %299 }
 0x115   :  { %v786_v51 = vsub.f32 %v287_v20, %v308_v49  ;;  %v788_v52 = vsub.f32 %v283_v19, %v300_v50 }
 0x117   :  { %v355_v53 = vmul.f32 1.442695, %v786_v51  ;;  %v347_v54 = vmul.f32 1.442695, %v788_v52 }
 0x119   :  { %601 = vpow2.f32 %v355_v53 }
 0x11a   :  { %603 = vpow2.f32 %v347_v54 }
 0x11c   :  { %v316_v55 = vpop.xlane.xlu2 %315  ;;  %v324_v56 = vpop.xlane.xlu0 %323 }
 0x11d   :  { %v792_v57 = vsub.f32 %v291_v23, %v316_v55  ;;  %v794_v58 = vsub.f32 %v295_v24, %v324_v56 }
 0x11f   :  { %v602_v59 = vpop.eup %601  ;;  %v363_v60 = vmul.f32 1.442695, %v792_v57  ;;  %v371_v61 = vmul.f32 1.442695, %v794_v58 }
 0x120   :  { %v604_v62 = vpop.eup %603  ;;  %387 = vadd.xlane.f32.xlu2 %v602_v59 }
 0x121   :  { %605 = vpow2.f32 %v363_v60  ;;  %379 = vadd.xlane.f32.xlu1 %v604_v62 }
 0x122   :  { %607 = vpow2.f32 %v371_v61 }
 0x124   :  { %v310_v63 = vpop.xlane.xlu2 %309  ;;  %v302_v0 = vpop.xlane.xlu0 %301 }
 0x125   :  { %v798_v1 = vsub.f32 %v288_v30, %v310_v63  ;;  %v800_v2 = vsub.f32 %v284_v29, %v302_v0  ;;  %v304_v3 = vpop.xlane.xlu1 %303 }
 0x126   :  { %v804_v8 = vsub.f32 %v285_v31, %v304_v3 }
 0x127   :  { %v606_v4 = vpop.eup %605  ;;  %v357_v5 = vmul.f32 1.442695, %v798_v1  ;;  %v349_v6 = vmul.f32 1.442695, %v800_v2 }
 0x128   :  { %v608_v7 = vpop.eup %607  ;;  %395 = vadd.xlane.f32.xlu0 %v606_v4  ;;  %v351_v9 = vmul.f32 1.442695, %v804_v8 }
 0x129   :  { %609 = vpow2.f32 %v357_v5  ;;  %403 = vadd.xlane.f32.xlu1 %v608_v7 }
 0x12a   :  { %611 = vpow2.f32 %v349_v6 }
 0x12b   :  { %613 = vpow2.f32 %v351_v9 }
 0x12c   :  { %v318_v10 = vpop.xlane.xlu0 %317 }
 0x12d   :  { %v807_v11 = vsub.f32 %v292_v35, %v318_v10  ;;  %v320_v12 = vpop.xlane.xlu1 %319 }
 0x12e   :  { %v809_v13 = vsub.f32 %v293_v34, %v320_v12 }
 0x12f   :  { %v610_v14 = vpop.eup %609  ;;  %v365_v15 = vmul.f32 1.442695, %v807_v11 }
 0x130   :  { %v612_v16 = vpop.eup %611  ;;  %v367_v17 = vmul.f32 1.442695, %v809_v13  ;;  %389 = vadd.xlane.f32.xlu0 %v610_v14 }
 0x131   :  { %615 = vpow2.f32 %v365_v15  ;;  %381 = vadd.xlane.f32.xlu2 %v612_v16  ;;  %v614_v23 = vpop.eup %613 }
 0x132   :  { %617 = vpow2.f32 %v367_v17 }
 0x133   :  { %v322_v18 = vpop.xlane.xlu2 %321 }
 0x134   :  { %v814_v19 = vsub.f32 %v767_v41, %v322_v18  ;;  %v312_v20 = vpop.xlane.xlu0 %311 }
 0x135   :  { %v817_v21 = vsub.f32 %v765_v39, %v312_v20  ;;  %v306_v22 = vpop.xlane.xlu1 %305 }
 0x136   :  { %v369_v24 = vmul.f32 1.442695, %v814_v19  ;;  %v822_v28 = vsub.f32 %v769_v42, %v306_v22 }
 0x137   :  { %v616_v25 = vpop.eup %615  ;;  %v359_v26 = vmul.f32 1.442695, %v817_v21 }
 0x138   :  { %v618_v27 = vpop.eup %617  ;;  %619 = vpow2.f32 %v369_v24  ;;  %383 = vadd.xlane.f32.xlu0 %v614_v23  ;;  %397 = vadd.xlane.f32.xlu1 %v616_v25  ;;  %v353_v30 = vmul.f32 1.442695, %v822_v28 }
 0x139   :  { %621 = vpow2.f32 %v359_v26  ;;  %399 = vadd.xlane.f32.xlu2 %v618_v27 }
 0x13a   :  { %623 = vpow2.f32 %v353_v30 }
 0x13b   :  { %v328_v29 = vpop.xlane.xlu2 %327 }
 0x13c   :  { %v826_v31 = vsub.f32 %v774_v44, %v328_v29  ;;  %v330_v35 = vpop.xlane.xlu0 %329 }
 0x13d   :  { %v314_v32 = vpop.xlane.xlu1 %313  ;;  %v834_v39 = vsub.f32 %v776_v46, %v330_v35 }
 0x13e   :  { %v620_v33 = vpop.eup %619  ;;  %v375_v34 = vmul.f32 1.442695, %v826_v31  ;;  %v830_v36 = vsub.f32 %v778_v47, %v314_v32 }
 0x13f   :  { %v622_v37 = vpop.eup %621  ;;  %v377_v40 = vmul.f32 1.442695, %v834_v39 }
 0x140   :  { %v361_v38 = vmul.f32 1.442695, %v830_v36  ;;  %401 = vadd.xlane.f32.xlu0 %v620_v33  ;;  %391 = vadd.xlane.f32.xlu1 %v622_v37  ;;  %625 = vpow2.f32 %v375_v34  ;;  %v624_v42 = vpop.eup %623 }
 0x142   :  { %627 = vpow2.f32 %v361_v38 }
 0x143   :  { %629 = vpow2.f32 %v377_v40 }
 0x145   :  { %v326_v41 = vpop.xlane.xlu1 %325 }
 0x146   :  { %v838_v43 = vsub.f32 %v783_v48, %v326_v41  ;;  %v626_v44 = vpop.eup %625 }
 0x148   :  { %v628_v45 = vpop.eup %627  ;;  %v373_v47 = vmul.f32 1.442695, %v838_v43  ;;  %407 = vadd.xlane.f32.xlu0 %v626_v44  ;;  %385 = vadd.xlane.f32.xlu1 %v624_v42 }
 0x149   :  { %393 = vadd.xlane.f32.xlu2 %v628_v45  ;;  %v630_v49 = vpop.eup %629 }
 0x14a   :  { %631 = vpow2.f32 %v373_v47 }
 0x150   :  { %v632_v46 = vpop.eup %631  ;;  %409 = vadd.xlane.f32.xlu1 %v630_v49 }
 0x151   :  { %405 = vadd.xlane.f32.xlu2 %v632_v46 }
 0x193   :  { %v388_v50 = vpop.xlane.xlu2 %387 }
 0x194   :  { %633 = vlog2.f32 %v388_v50  ;;  %v380_v53 = vpop.xlane.xlu1 %379 }
 0x195   :  { %635 = vlog2.f32 %v380_v53 }
 0x19a   :  { %v634_v54 = vpop.eup %633 }
 0x19b   :  { %v636_v48 = vpop.eup %635  ;;  %v420_v55 = vmul.f32 0.6931472, %v634_v54  ;;  %v396_v56 = vpop.xlane.xlu0 %395 }
 0x19c   :  { %v412_v59 = vmul.f32 0.6931472, %v636_v48  ;;  %637 = vlog2.f32 %v396_v56  ;;  %v404_v60 = vpop.xlane.xlu1 %403 }
 0x19d   :  { %v447_v61 = vsub.f32 %v786_v51, %v420_v55  ;;  %639 = vlog2.f32 %v404_v60 }
 0x19e   :  { %v443_v62 = vsub.f32 %v788_v52, %v412_v59 }
 0x19f   :  { %463 = vst [vmem:[#allocation3 + $0x20] sm:$0xff] %v447_v61 }
 0x1a0   :  { %459 = vst [vmem:[#allocation3] sm:$0xff] %v443_v62 }
 0x1a2   :  { %v638_v63 = vpop.eup %637 }
 0x1a3   :  { %v640_v0 = vpop.eup %639  ;;  %v428_v3 = vmul.f32 0.6931472, %v638_v63  ;;  %v390_v4 = vpop.xlane.xlu0 %389 }
 0x1a4   :  { %v436_v5 = vmul.f32 0.6931472, %v640_v0  ;;  %v382_v6 = vpop.xlane.xlu2 %381  ;;  %641 = vlog2.f32 %v390_v4 }
 0x1a5   :  { %v451_v7 = vsub.f32 %v792_v57, %v428_v3  ;;  %643 = vlog2.f32 %v382_v6 }
 0x1a6   :  { %v455_v9 = vsub.f32 %v794_v58, %v436_v5 }
 0x1a7   :  { %467 = vst [vmem:[#allocation3 + $0x40] sm:$0xff] %v451_v7 }
 0x1a8   :  { %471 = vst [vmem:[#allocation3 + $0x60] sm:$0xff] %v455_v9 }
 0x1aa   :  { %v642_v51 = vpop.eup %641 }
 0x1ab   :  { %v644_v10 = vpop.eup %643  ;;  %v422_v12 = vmul.f32 0.6931472, %v642_v51  ;;  %v384_v52 = vpop.xlane.xlu0 %383 }
 0x1ac   :  { %v398_v14 = vpop.xlane.xlu1 %397  ;;  %v414_v15 = vmul.f32 0.6931472, %v644_v10  ;;  %645 = vlog2.f32 %v384_v52  ;;  %v400_v16 = vpop.xlane.xlu2 %399 }
 0x1ad   :  { %v448_v17 = vsub.f32 %v798_v1, %v422_v12  ;;  %647 = vlog2.f32 %v400_v16 }
 0x1ae   :  { %v444_v18 = vsub.f32 %v800_v2, %v414_v15  ;;  %649 = vlog2.f32 %v398_v14 }
 0x1af   :  { %464 = vst [vmem:[#allocation3 + $0x28] sm:$0xff] %v448_v17 }
 0x1b0   :  { %460 = vst [vmem:[#allocation3 + $0x8] sm:$0xff] %v444_v18 }
 0x1b2   :  { %v646_v57 = vpop.eup %645 }
 0x1b3   :  { %v648_v58 = vpop.eup %647  ;;  %v416_v20 = vmul.f32 0.6931472, %v646_v57  ;;  %v402_v22 = vpop.xlane.xlu0 %401 }
 0x1b4   :  { %v392_v23 = vpop.xlane.xlu1 %391  ;;  %v650_v24 = vpop.eup %649  ;;  %v432_v25 = vmul.f32 0.6931472, %v648_v58  ;;  %651 = vlog2.f32 %v402_v22 }
 0x1b5   :  { %v445_v26 = vsub.f32 %v804_v8, %v416_v20  ;;  %v430_v27 = vmul.f32 0.6931472, %v650_v24  ;;  %653 = vlog2.f32 %v392_v23 }
 0x1b6   :  { %v453_v1 = vsub.f32 %v809_v13, %v432_v25 }
 0x1b7   :  { %461 = vst [vmem:[#allocation3 + $0x10] sm:$0xff] %v445_v26  ;;  %v452_v2 = vsub.f32 %v807_v11, %v430_v27 }
 0x1b8   :  { %469 = vst [vmem:[#allocation3 + $0x50] sm:$0xff] %v453_v1 }
 0x1b9   :  { %468 = vst [vmem:[#allocation3 + $0x48] sm:$0xff] %v452_v2 }
 0x1ba   :  { %v652_v29 = vpop.eup %651 }
 0x1bb   :  { %v654_v30 = vpop.eup %653  ;;  %v434_v32 = vmul.f32 0.6931472, %v652_v29  ;;  %v408_v33 = vpop.xlane.xlu0 %407 }
 0x1bc   :  { %v386_v34 = vpop.xlane.xlu1 %385  ;;  %v424_v35 = vmul.f32 0.6931472, %v654_v30  ;;  %655 = vlog2.f32 %v408_v33  ;;  %v394_v37 = vpop.xlane.xlu2 %393 }
 0x1bd   :  { %v454_v38 = vsub.f32 %v814_v19, %v434_v32  ;;  %657 = vlog2.f32 %v394_v37 }
 0x1be   :  { %v449_v8 = vsub.f32 %v817_v21, %v424_v35  ;;  %659 = vlog2.f32 %v386_v34 }
 0x1bf   :  { %470 = vst [vmem:[#allocation3 + $0x58] sm:$0xff] %v454_v38 }
 0x1c0   :  { %465 = vst [vmem:[#allocation3 + $0x30] sm:$0xff] %v449_v8 }
 0x1c2   :  { %v656_v13 = vpop.eup %655 }
 0x1c3   :  { %v658_v11 = vpop.eup %657  ;;  %v440_v40 = vmul.f32 0.6931472, %v656_v13 }
 0x1c4   :  { %v410_v41 = vpop.xlane.xlu1 %409  ;;  %v660_v42 = vpop.eup %659  ;;  %v426_v44 = vmul.f32 0.6931472, %v658_v11 }
 0x1c5   :  { %v406_v45 = vpop.xlane.xlu2 %405  ;;  %661 = vlog2.f32 %v410_v41  ;;  %v457_v47 = vsub.f32 %v826_v31, %v440_v40  ;;  %v418_v49 = vmul.f32 0.6931472, %v660_v42 }
 0x1c6   :  { %663 = vlog2.f32 %v406_v45  ;;  %v450_v19 = vsub.f32 %v830_v36, %v426_v44 }
 0x1c7   :  { %473 = vst [vmem:[#allocation3 + $0x70] sm:$0xff] %v457_v47  ;;  %v446_v21 = vsub.f32 %v822_v28, %v418_v49 }
 0x1c8   :  { %466 = vst [vmem:[#allocation3 + $0x38] sm:$0xff] %v450_v19 }
 0x1c9   :  { %462 = vst [vmem:[#allocation3 + $0x18] sm:$0xff] %v446_v21 }
 0x1cb   :  { %v662_v46 = vpop.eup %661 }
 0x1cc   :  { %v664_v50 = vpop.eup %663  ;;  %v442_v53 = vmul.f32 0.6931472, %v662_v46 }
 0x1cd   :  { %v438_v54 = vmul.f32 0.6931472, %v664_v50 }
 0x1ce   :  { %v458_v31 = vsub.f32 %v834_v39, %v442_v53 }
 0x1cf   :  { %v456_v36 = vsub.f32 %v838_v43, %v438_v54 }
 0x1d0   :  { %474 = vst [vmem:[#allocation3 + $0x78] sm:$0xff] %v458_v31 }
 0x1d1   :  { %472 = vst [vmem:[#allocation3 + $0x68] sm:$0xff] %v456_v36 }
 0x1d2   :  { %487 = dma.vmem_to_hbm [thread:$0]  %s480_s2, 2048, %s482_s20, [#allocation4], %s692_s21, %s692_s21, %s693_s22  }
 0x1d3   :  { %689 = dma.done.wait [#allocation4], 2048  }
 0x1d4   :  { %690 = vsyncadd [#allocation4], 4294965248 }
 0x1d5   :  { %492 = vsyncpa [#allocation4], 1 }

// kernel: gcn_forward_padded.2
= control target key start
LH: loop header
LB: loop body
LE: loop exit
PB: predicated region body
PF: predicated region fallthrough
CT: control target
= control target key end

     0   :  { %v686_v0 = vmov 0   ;;  %s843_s1 = inlined_call_operand.vmem [shape: f32[128,1], index: 1, kind: input, shape index: {}]   ;;  %s844_s2 = inlined_call_operand.vmem [shape: f32[1,128], index: 2, kind: input, shape index: {}]   ;;  %s845_s3 = inlined_call_operand.vmem [shape: f32[1,128], index: 3, kind: input, shape index: {}]   ;;  %s846_s0 = inlined_call_operand.vmem [shape: bf16[128,128], index: 0, kind: input, shape index: {}]   ;;  %s847_s4 = inlined_call_operand.vmem [shape: bf16[128,128], index: 4, kind: input, shape index: {}]   ;;  %s848_s5 = inlined_call_operand.vmem [shape: bf16[128,128], index: 5, kind: output, shape index: {}]  }
   0x1   :  { %683 = vset.pattern.permute.xlu2 %v686_v0  ;;  %682 = vset.pattern.permute.xlu1 %v686_v0  ;;  %v54_v1 = vld [vmem:[%s843_s1 + $0x70] sm:$0xff]  ;;  %v52_v2 = vld [vmem:[%s843_s1 + $0x60] sm:$0xff]  ;;  %v53_v4 = vld [vmem:[%s843_s1 + $0x68] sm:$0xff] }
   0x2   :  { %v50_v3 = vld [vmem:[%s843_s1 + $0x50] sm:$0xff]  ;;  %681 = vset.pattern.permute.xlu0 %v686_v0  ;;  %119 = vperm.xlu1 %682, %v52_v2   ;;  %v55_v5 = vld [vmem:[%s843_s1 + $0x78] sm:$0xff]  ;;  %v49_v7 = vld [vmem:[%s843_s1 + $0x48] sm:$0xff] }
   0x3   :  { %129 = vperm.xlu0 %681, %v54_v1   ;;  %109 = vperm.xlu2 %683, %v50_v3   ;;  %v51_v6 = vld [vmem:[%s843_s1 + $0x58] sm:$0xff]  ;;  %v48_v8 = vld [vmem:[%s843_s1 + $0x40] sm:$0xff]  ;;  %v46_v9 = vld [vmem:[%s843_s1 + $0x30] sm:$0xff] }
   0x4   :  { %v44_v10 = vld [vmem:[%s843_s1 + $0x20] sm:$0xff]  ;;  %v47_v11 = vld [vmem:[%s843_s1 + $0x38] sm:$0xff]  ;;  %v45_v12 = vld [vmem:[%s843_s1 + $0x28] sm:$0xff] }
   0x5   :  { %v43_v13 = vld [vmem:[%s843_s1 + $0x18] sm:$0xff]  ;;  %v42_v14 = vld [vmem:[%s843_s1 + $0x10] sm:$0xff]  ;;  %v40_v15 = vld [vmem:[%s843_s1] sm:$0xff] }
   0x6   :  { %v41_v16 = vld [vmem:[%s843_s1 + $0x8] sm:$0xff]  ;;  %v684_v20 = vld [vmem:[%s844_s2] ss:$0 sm:$0xff]  ;;  %v616_v62 = vld [vmem:[%s847_s4 + $0x38] sm:$0xff] }
   0x7   :  { %v601_v58 = vld [vmem:[%s846_s0] sm:$0xff]  ;;  %v602_v60 = vld [vmem:[%s846_s0 + $0x8] sm:$0xff]  ;;  %452 = vmatpush.bf16.msra.mxu1 %v616_v62  ;;  %v615_v63 = vld [vmem:[%s847_s4 + $0x30] sm:$0xff]  ;;  %672 = vmatpush.bf16.msra.mxu3 %v616_v62 }
   0x8   :  { %v605_v59 = vld [vmem:[%s846_s0 + $0x20] sm:$0xff]  ;;  %v606_v61 = vld [vmem:[%s846_s0 + $0x28] sm:$0xff]  ;;  %v603_v2 = vld [vmem:[%s846_s0 + $0x10] sm:$0xff] }
   0x9   :  { %v614_v0 = vld [vmem:[%s847_s4 + $0x28] sm:$0xff]  ;;  %v613_v1 = vld [vmem:[%s847_s4 + $0x20] sm:$0xff]  ;;  %v607_v3 = vld [vmem:[%s846_s0 + $0x30] sm:$0xff] }
   0xa   :  { %124 = vperm.xlu1 %682, %v53_v4   ;;  %v604_v4 = vld [vmem:[%s846_s0 + $0x18] sm:$0xff] }
   0xb   :  { %134 = vperm.xlu0 %681, %v55_v5   ;;  %114 = vperm.xlu2 %683, %v51_v6   ;;  %v608_v5 = vld [vmem:[%s846_s0 + $0x38] sm:$0xff] }
   0xc   :  { %453 = vmatpush.bf16.msra.mxu1 %v615_v63  ;;  %673 = vmatpush.bf16.msra.mxu3 %v615_v63  ;;  %v612_v6 = vld [vmem:[%s847_s4 + $0x18] sm:$0xff] }
  0x10   :  { %454 = vmatpush.bf16.msra.mxu1 %v614_v0  ;;  %674 = vmatpush.bf16.msra.mxu3 %v614_v0 }
  0x12   :  { %104 = vperm.xlu1 %682, %v49_v7   ;;  %v611_v7 = vld [vmem:[%s847_s4 + $0x10] sm:$0xff] }
  0x13   :  { %99 = vperm.xlu0 %681, %v48_v8   ;;  %89 = vperm.xlu2 %683, %v46_v9   ;;  %v610_v8 = vld [vmem:[%s847_s4 + $0x8] sm:$0xff]  ;;  %v609_v9 = vld [vmem:[%s847_s4] sm:$0xff] }
  0x14   :  { %455 = vmatpush.bf16.msra.mxu1 %v613_v1  ;;  %675 = vmatpush.bf16.msra.mxu3 %v613_v1 }
  0x18   :  { %456 = vmatpush.bf16.msra.mxu1 %v612_v6  ;;  %676 = vmatpush.bf16.msra.mxu3 %v612_v6 }
  0x1a   :  { %79 = vperm.xlu1 %682, %v44_v10  }
  0x1b   :  { %94 = vperm.xlu0 %681, %v47_v11   ;;  %84 = vperm.xlu2 %683, %v45_v12   ;;  %v685_v11 = vld [vmem:[%s845_s3] ss:$0 sm:$0xff] }
  0x1c   :  { %457 = vmatpush.bf16.msra.mxu1 %v611_v7  ;;  %677 = vmatpush.bf16.msra.mxu3 %v611_v7 }
  0x20   :  { %458 = vmatpush.bf16.msra.mxu1 %v610_v8  ;;  %678 = vmatpush.bf16.msra.mxu3 %v610_v8 }
  0x22   :  { %74 = vperm.xlu1 %682, %v43_v13  }
  0x23   :  { %69 = vperm.xlu0 %681, %v42_v14   ;;  %59 = vperm.xlu2 %683, %v40_v15  }
  0x24   :  { %459 = vmatpush.bf16.msra.mxu1 %v609_v9  ;;  %679 = vmatpush.bf16.msra.mxu3 %v609_v9 }
  0x2b   :  { %64 = vperm.xlu0 %681, %v41_v16  }
  0x5d   :  { %v110_v17 = vpop.permute.xlu2 %109 }
  0x5e   :  { %v150_v29 = vmul.f32 %v684_v20, %v110_v17 }
  0x65   :  { %v115_v22 = vpop.permute.xlu2 %114 }
  0x66   :  { %v151_v30 = vmul.f32 %v684_v20, %v115_v22 }
  0x68   :  { %v193_v37 = vpack.c.bf16 %v151_v30, %v150_v29 }
  0x6d   :  { %v90_v34 = vpop.permute.xlu2 %89 }
  0x6e   :  { %v146_v41 = vmul.f32 %v684_v20, %v90_v34 }
  0x74   :  { %v120_v18 = vpop.permute.xlu1 %119 }
  0x75   :  { %v130_v19 = vpop.permute.xlu0 %129  ;;  %v152_v28 = vmul.f32 %v684_v20, %v120_v18  ;;  %v85_v45 = vpop.permute.xlu2 %84 }
  0x76   :  { %v154_v24 = vmul.f32 %v684_v20, %v130_v19  ;;  %v145_v46 = vmul.f32 %v684_v20, %v85_v45 }
  0x7c   :  { %v125_v21 = vpop.permute.xlu1 %124 }
  0x7d   :  { %v135_v23 = vpop.permute.xlu0 %134  ;;  %v153_v26 = vmul.f32 %v684_v20, %v125_v21  ;;  %v60_v53 = vpop.permute.xlu2 %59 }
  0x7e   :  { %v155_v25 = vmul.f32 %v684_v20, %v135_v23  ;;  %v140_v55 = vmul.f32 %v684_v20, %v60_v53 }
  0x7f   :  { %v194_v32 = vpack.c.bf16 %v153_v26, %v152_v28 }
  0x80   :  { %v195_v27 = vpack.c.bf16 %v155_v25, %v154_v24 }
  0x82   :  { %244 = vmatpush.bf16.msra.mxu0 %v195_v27  ;;  %664 = vmatpush.bf16.msra.mxu2 %v195_v27 }
  0x84   :  { %v105_v31 = vpop.permute.xlu1 %104 }
  0x85   :  { %v100_v33 = vpop.permute.xlu0 %99  ;;  %v149_v35 = vmul.f32 %v684_v20, %v105_v31 }
  0x86   :  { %245 = vmatpush.bf16.msra.mxu0 %v194_v32  ;;  %665 = vmatpush.bf16.msra.mxu2 %v194_v32  ;;  %v148_v36 = vmul.f32 %v684_v20, %v100_v33 }
  0x88   :  { %v192_v39 = vpack.c.bf16 %v149_v35, %v148_v36 }
  0x8a   :  { %246 = vmatpush.bf16.msra.mxu0 %v193_v37  ;;  %666 = vmatpush.bf16.msra.mxu2 %v193_v37 }
  0x8c   :  { %v80_v38 = vpop.permute.xlu1 %79 }
  0x8d   :  { %v95_v40 = vpop.permute.xlu0 %94  ;;  %v144_v43 = vmul.f32 %v684_v20, %v80_v38 }
  0x8e   :  { %v147_v42 = vmul.f32 %v684_v20, %v95_v40  ;;  %247 = vmatpush.bf16.msra.mxu0 %v192_v39  ;;  %667 = vmatpush.bf16.msra.mxu2 %v192_v39 }
  0x8f   :  { %v190_v48 = vpack.c.bf16 %v145_v46, %v144_v43 }
  0x90   :  { %v191_v44 = vpack.c.bf16 %v147_v42, %v146_v41 }
  0x92   :  { %248 = vmatpush.bf16.msra.mxu0 %v191_v44  ;;  %668 = vmatpush.bf16.msra.mxu2 %v191_v44 }
  0x94   :  { %v75_v47 = vpop.permute.xlu1 %74 }
  0x95   :  { %v143_v49 = vmul.f32 %v684_v20, %v75_v47  ;;  %v70_v50 = vpop.permute.xlu0 %69 }
  0x96   :  { %v142_v51 = vmul.f32 %v684_v20, %v70_v50  ;;  %249 = vmatpush.bf16.msra.mxu0 %v190_v48  ;;  %669 = vmatpush.bf16.msra.mxu2 %v190_v48 }
  0x98   :  { %v189_v52 = vpack.c.bf16 %v143_v49, %v142_v51 }
  0x9a   :  { %250 = vmatpush.bf16.msra.mxu0 %v189_v52  ;;  %670 = vmatpush.bf16.msra.mxu2 %v189_v52 }
  0x9d   :  { %v65_v54 = vpop.permute.xlu0 %64 }
  0x9e   :  { %v141_v56 = vmul.f32 %v684_v20, %v65_v54 }
  0xa0   :  { %v188_v57 = vpack.c.bf16 %v141_v56, %v140_v55 }
  0xa2   :  { %251 = vmatpush.bf16.msra.mxu0 %v188_v57  ;;  %671 = vmatpush.bf16.msra.mxu2 %v188_v57 }
  0xa5   :  { %252 = vmatmul.bf16.vlgmr.msra.gmra.mxu0 %v601_v58  ;;  %272 = vmatmul.bf16.vlgmr.msra.gmra.mxu2 %v605_v59 }
  0xb5   :  { %257 = vmatmul.bf16.gmra.mxu0 %v602_v60  ;;  %277 = vmatmul.bf16.gmra.mxu2 %v606_v61 }
  0xc5   :  { %262 = vmatmul.bf16.gmra.mxu0 %v603_v2  ;;  %282 = vmatmul.bf16.gmra.mxu2 %v607_v3 }
  0xd5   :  { %267 = vmatmul.bf16.gmra.mxu0 %v604_v4  ;;  %287 = vmatmul.bf16.gmra.mxu2 %v608_v5 }
 0x122   :  { %v253_v10 = vpop.f32.mrf.mxu0 }
 0x123   :  { %v348_v12 = vadd.f32 %v685_v11, %v253_v10 }
 0x125   :  { %v364_v15 = vmax.f32 %v348_v12, 0.0 }
 0x128   :  { %v273_v13 = vpop.f32.mrf.mxu2 }
 0x129   :  { %v356_v18 = vadd.f32 %v685_v11, %v273_v13 }
 0x12a   :  { %v255_v14 = vpop.f32.mrf.mxu0 }
 0x12b   :  { %v349_v16 = vadd.f32 %v685_v11, %v255_v14  ;;  %v372_v23 = vmax.f32 %v356_v18, 0.0 }
 0x12d   :  { %v365_v17 = vmax.f32 %v349_v16, 0.0 }
 0x12f   :  { %v380_v19 = vpack.c.bf16 %v365_v17, %v364_v15 }
 0x130   :  { %v275_v20 = vpop.f32.mrf.mxu2 }
 0x131   :  { %v357_v21 = vadd.f32 %v685_v11, %v275_v20  ;;  %460 = vmatmul.bf16.vlgmr.msra.gmra.mxu1 %v380_v19 }
 0x132   :  { %v258_v22 = vpop.f32.mrf.mxu0 }
 0x133   :  { %v373_v24 = vmax.f32 %v357_v21, 0.0  ;;  %v350_v26 = vadd.f32 %v685_v11, %v258_v22 }
 0x135   :  { %v384_v25 = vpack.c.bf16 %v373_v24, %v372_v23  ;;  %v366_v29 = vmax.f32 %v350_v26, 0.0 }
 0x137   :  { %480 = vmatmul.bf16.vlgmr.msra.gmra.mxu3 %v384_v25 }
 0x138   :  { %v278_v27 = vpop.f32.mrf.mxu2 }
 0x139   :  { %v358_v32 = vadd.f32 %v685_v11, %v278_v27 }
 0x13a   :  { %v260_v28 = vpop.f32.mrf.mxu0 }
 0x13b   :  { %v351_v30 = vadd.f32 %v685_v11, %v260_v28  ;;  %v374_v37 = vmax.f32 %v358_v32, 0.0 }
 0x13d   :  { %v367_v31 = vmax.f32 %v351_v30, 0.0 }
 0x13f   :  { %v381_v33 = vpack.c.bf16 %v367_v31, %v366_v29 }
 0x140   :  { %v280_v34 = vpop.f32.mrf.mxu2 }
 0x141   :  { %v359_v35 = vadd.f32 %v685_v11, %v280_v34  ;;  %465 = vmatmul.bf16.gmra.mxu1 %v381_v33 }
 0x142   :  { %v263_v36 = vpop.f32.mrf.mxu0 }
 0x143   :  { %v375_v38 = vmax.f32 %v359_v35, 0.0  ;;  %v352_v40 = vadd.f32 %v685_v11, %v263_v36 }
 0x145   :  { %v385_v39 = vpack.c.bf16 %v375_v38, %v374_v37  ;;  %v368_v43 = vmax.f32 %v352_v40, 0.0 }
 0x147   :  { %485 = vmatmul.bf16.gmra.mxu3 %v385_v39 }
 0x148   :  { %v283_v41 = vpop.f32.mrf.mxu2 }
 0x149   :  { %v360_v46 = vadd.f32 %v685_v11, %v283_v41 }
 0x14a   :  { %v265_v42 = vpop.f32.mrf.mxu0 }
 0x14b   :  { %v353_v44 = vadd.f32 %v685_v11, %v265_v42  ;;  %v376_v51 = vmax.f32 %v360_v46, 0.0 }
 0x14d   :  { %v369_v45 = vmax.f32 %v353_v44, 0.0 }
 0x14f   :  { %v382_v47 = vpack.c.bf16 %v369_v45, %v368_v43 }
 0x150   :  { %v285_v48 = vpop.f32.mrf.mxu2 }
 0x151   :  { %v361_v49 = vadd.f32 %v685_v11, %v285_v48  ;;  %470 = vmatmul.bf16.gmra.mxu1 %v382_v47 }
 0x152   :  { %v268_v50 = vpop.f32.mrf.mxu0 }
 0x153   :  { %v377_v52 = vmax.f32 %v361_v49, 0.0  ;;  %v354_v54 = vadd.f32 %v685_v11, %v268_v50 }
 0x155   :  { %v386_v53 = vpack.c.bf16 %v377_v52, %v376_v51  ;;  %v370_v57 = vmax.f32 %v354_v54, 0.0 }
 0x157   :  { %490 = vmatmul.bf16.gmra.mxu3 %v386_v53 }
 0x158   :  { %v288_v55 = vpop.f32.mrf.mxu2 }
 0x159   :  { %v362_v60 = vadd.f32 %v685_v11, %v288_v55 }
 0x15a   :  { %v270_v56 = vpop.f32.mrf.mxu0 }
 0x15b   :  { %v355_v58 = vadd.f32 %v685_v11, %v270_v56  ;;  %v378_v0 = vmax.f32 %v362_v60, 0.0 }
 0x15d   :  { %v371_v59 = vmax.f32 %v355_v58, 0.0 }
 0x15f   :  { %v383_v61 = vpack.c.bf16 %v371_v59, %v370_v57 }
 0x160   :  { %v290_v62 = vpop.f32.mrf.mxu2 }
 0x161   :  { %v363_v63 = vadd.f32 %v685_v11, %v290_v62  ;;  %475 = vmatmul.bf16.gmra.mxu1 %v383_v61 }
 0x163   :  { %v379_v1 = vmax.f32 %v363_v63, 0.0 }
 0x165   :  { %v387_v2 = vpack.c.bf16 %v379_v1, %v378_v0 }
 0x167   :  { %495 = vmatmul.bf16.gmra.mxu3 %v387_v2 }
 0x1ae   :  { %v461_v3 = vpop.f32.mrf.mxu1 }
 0x1b6   :  { %v463_v4 = vpop.f32.mrf.mxu1 }
 0x1b7   :  { %v620_v5 = vpack.c.bf16 %v463_v4, %v461_v3 }
 0x1b9   :  { %621 = vst [vmem:[%s848_s5] sm:$0xff] %v620_v5  }
 0x1ba   :  { %v481_v6 = vpop.f32.mrf.mxu3 }
 0x1be   :  { %v466_v7 = vpop.f32.mrf.mxu1 }
 0x1c2   :  { %v483_v8 = vpop.f32.mrf.mxu3 }
 0x1c3   :  { %v640_v9 = vpack.c.bf16 %v483_v8, %v481_v6 }
 0x1c5   :  { %660 = vst [vmem:[%s848_s5 + $0x20] sm:$0xff] %v640_v9  }
 0x1c6   :  { %v468_v10 = vpop.f32.mrf.mxu1 }
 0x1c7   :  { %v625_v11 = vpack.c.bf16 %v468_v10, %v466_v7 }
 0x1c9   :  { %657 = vst [vmem:[%s848_s5 + $0x8] sm:$0xff] %v625_v11  }
 0x1ca   :  { %v486_v12 = vpop.f32.mrf.mxu3 }
 0x1ce   :  { %v471_v13 = vpop.f32.mrf.mxu1 }
 0x1d2   :  { %v488_v14 = vpop.f32.mrf.mxu3 }
 0x1d3   :  { %v645_v15 = vpack.c.bf16 %v488_v14, %v486_v12 }
 0x1d5   :  { %661 = vst [vmem:[%s848_s5 + $0x28] sm:$0xff] %v645_v15  }
 0x1d6   :  { %v473_v16 = vpop.f32.mrf.mxu1 }
 0x1d7   :  { %v630_v17 = vpack.c.bf16 %v473_v16, %v471_v13 }
 0x1d9   :  { %658 = vst [vmem:[%s848_s5 + $0x10] sm:$0xff] %v630_v17  }
 0x1da   :  { %v491_v18 = vpop.f32.mrf.mxu3 }
 0x1de   :  { %v476_v19 = vpop.f32.mrf.mxu1 }
 0x1e2   :  { %v493_v20 = vpop.f32.mrf.mxu3 }
 0x1e3   :  { %v650_v21 = vpack.c.bf16 %v493_v20, %v491_v18 }
 0x1e5   :  { %662 = vst [vmem:[%s848_s5 + $0x30] sm:$0xff] %v650_v21  }
 0x1e6   :  { %v478_v22 = vpop.f32.mrf.mxu1 }
 0x1e7   :  { %v635_v23 = vpack.c.bf16 %v478_v22, %v476_v19 }
 0x1e9   :  { %659 = vst [vmem:[%s848_s5 + $0x18] sm:$0xff] %v635_v23  }
 0x1ea   :  { %v496_v24 = vpop.f32.mrf.mxu3 }
 0x1f2   :  { %v498_v25 = vpop.f32.mrf.mxu3 }
 0x1f3   :  { %v655_v26 = vpack.c.bf16 %v498_v25, %v496_v24 }
 0x1f5   :  { %663 = vst [vmem:[%s848_s5 + $0x38] sm:$0xff] %v655_v26  }

</bundles_post_ra>
